<compile_context>
chip_gen: v7x
topology: tpu7x:2x2x1
jax: 0.10.0
libtpu: 0.0.40
codegen_flags: <defaults>
</compile_context>

<pallas_src>
from functools import partial

import jax
import jax.numpy as jnp
from jax.experimental import pallas as pl
from jax.experimental.pallas import tpu as pltpu


def _patch_embed_kernel(x_ref, w_ref, b_ref, o_ref):
    # x_ref: (tm, Kp) flattened patches, w_ref: (Kp, Dp), b_ref: (1, Dp) f32,
    # o_ref: (tm, Dp).  Accumulate in f32 on the MXU, add bias, cast out.
    acc = jnp.dot(x_ref[...], w_ref[...], preferred_element_type=jnp.float32)
    o_ref[...] = (acc + b_ref[...]).astype(o_ref.dtype)


def _round_up(x, m):
    return (x + m - 1) // m * m


def _cdiv(a, b):
    return -(-a // b)


@partial(jax.jit,
         static_argnames=("patch_size", "mxu_dtype", "out_dtype", "tm_cap"))
def patch_embed(x, weight, bias, *, patch_size, mxu_dtype=jnp.bfloat16,
                out_dtype=None, tm_cap=2048):
    """Equivalent of PatchEmbed.forward: proj(x).flatten(2).transpose(1, 2).

    x:      (B, C, H, W)  NCHW, as for nn.Conv2d
    weight: (D, C, p, p)  conv weight
    bias:   (D,)          conv bias
    returns (B, num_patches, D) in `out_dtype` (defaults to x.dtype)
    """
    B, C, H, W = x.shape
    p = patch_size
    D = weight.shape[0]
    assert H % p == 0 and W % p == 0, "image size must be divisible by patch size"
    gh, gw = H // p, W // p
    n_patches = gh * gw
    K = C * p * p
    M = B * n_patches

    out_dtype = jnp.dtype(out_dtype) if out_dtype is not None else jnp.dtype(x.dtype)
    compute_dtype = jnp.dtype(mxu_dtype) if mxu_dtype is not None else jnp.dtype(x.dtype)

    # ---- cast FIRST, then layout glue ------------------------------------
    # Casting before the patchify halves the HBM bytes of the dominant
    # activation stream (and of the materialized transpose pass).
    x = x.astype(compute_dtype)

    # Non-overlapping patch extraction -> (M, K), flattened (c, kh, kw) to
    # match the conv-weight reshape.  Materialized once in the compute dtype
    # so the Pallas input DMA sees big contiguous (tm, Kp) tiles.
    patches = x.reshape(B, C, gh, p, gw, p)
    patches = patches.transpose(0, 2, 4, 1, 3, 5).reshape(M, K)

    w2d = weight.reshape(D, K).T.astype(compute_dtype)      # (K, D)
    b2d = bias.reshape(1, D).astype(jnp.float32)             # (1, D)

    # ---- lane-dense padding ------------------------------------------------
    # Dp: output/weight lane axis -> multiple of 128 (unmasked vst, clean MXU).
    # Kp: pad to a multiple of 128 when K spans more than one lane tile
    #     (e.g. DINOv2 p=14 -> K=588 -> 640); no-op for ViT-B/L (K=768).
    Dp = _round_up(D, 128)
    Kp = _round_up(K, 128) if K > 128 else K
    if Dp != D:
        w2d = jnp.pad(w2d, ((0, 0), (0, Dp - D)))
        b2d = jnp.pad(b2d, ((0, 0), (0, Dp - D)))
    if Kp != K:
        patches = jnp.pad(patches, ((0, 0), (0, Kp - K)))
        w2d = jnp.pad(w2d, ((0, Kp - K), (0, 0)))

    in_item = jnp.dtype(compute_dtype).itemsize
    out_item = jnp.dtype(out_dtype).itemsize

    # Sublane row alignment for the M axis: 16-bit dtypes pack 2 rows/sublane,
    # 8-bit dtypes 4 (avoids masked sublane pairs on the load/store path).
    row_align = {4: 8, 2: 16, 1: 32}[in_item]

    # ---- M-tile selection from an explicit VMEM budget ---------------------
    # Per-step VMEM = 2x x-tile + 2x out-tile (double-buffered) + resident
    # weight + bias (single-buffered).  40 MiB of tiles is safe on v7x's
    # 64 MiB physical VMEM and trivially fits v5e/v6e's 128 MiB.
    VMEM_TILE_BUDGET = 40 * 1024 * 1024

    def step_vmem(tm_):
        return (2 * tm_ * Kp * in_item       # x tile, double-buffered
                + Kp * Dp * in_item          # weight, single-buffered
                + Dp * 4                     # bias (f32), single-buffered
                + 2 * tm_ * Dp * out_item)   # out tile, double-buffered

    resident = Kp * Dp * in_item + Dp * 4
    per_row = 2 * Kp * in_item + 2 * Dp * out_item
    tm_budget = max(row_align, (VMEM_TILE_BUDGET - resident) // per_row)

    Mr = _round_up(M, row_align)
    tm = min(tm_cap, tm_budget, Mr)
    tm = max(row_align, (tm // row_align) * row_align)

    steps = _cdiv(Mr, tm)
    # Megacore-aware grid: aim for an even number of steps (>= 4) so v7x's two
    # TensorCores get balanced work and the pipeline actually overlaps.
    if steps < 4 and Mr >= 4 * row_align:
        steps = 4
    if steps > 1 and steps % 2:
        steps += 1
    tm = min(tm, _round_up(_cdiv(Mr, steps), row_align))
    Mp = _round_up(Mr, tm)

    if Mp != M:
        patches = jnp.pad(patches, ((0, Mp - M), (0, 0)))

    grid = (Mp // tm,)

    # Scoped-VMEM limit computed from the actual tile footprint (+headroom),
    # kept below v7x's 64 MiB physical VMEM.
    vmem_limit = int(min(60 * 1024 * 1024,
                         max(32 * 1024 * 1024, step_vmem(tm) + 4 * 1024 * 1024)))

    cost = pl.CostEstimate(
        flops=2 * Mp * Kp * Dp,
        transcendentals=0,
        bytes_accessed=(Mp * Kp * in_item + Kp * Dp * in_item
                        + Dp * 4 + Mp * Dp * out_item),
    )

    out = pl.pallas_call(
        _patch_embed_kernel,
        out_shape=jax.ShapeDtypeStruct((Mp, Dp), out_dtype),
        grid=grid,
        in_specs=[
            pl.BlockSpec((tm, Kp), lambda i: (i, 0)),            # pipelined over M
            pl.BlockSpec((Kp, Dp), lambda i: (0, 0),
                         pipeline_mode=pl.Buffered(1)),          # resident weight
            pl.BlockSpec((1, Dp), lambda i: (0, 0),
                         pipeline_mode=pl.Buffered(1)),          # resident bias
        ],
        out_specs=pl.BlockSpec((tm, Dp), lambda i: (i, 0)),
        compiler_params=pltpu.CompilerParams(
            dimension_semantics=("parallel",),    # megacore shards M on v7x
            vmem_limit_bytes=vmem_limit,
        ),
        cost_estimate=cost,
    )(patches, w2d, b2d)

    out = out[:M, :D]
    return out.reshape(B, n_patches, D)


if __name__ == "__main__":
    # Small shapes consistent with the module:
    # img_size=16, patch_size=4, in_chans=4, embed_dim=32 -> num_patches = 16
    B, C, IMG, P, D = 2, 4, 16, 4, 32

    key = jax.random.PRNGKey(0)
    kx, kw, kb = jax.random.split(key, 3)

    x = jax.random.normal(kx, (B, C, IMG, IMG), dtype=jnp.float32)
    # Deterministic synthetic Conv2d parameters (nn.Conv2d(in_chans, embed_dim, P, P))
    weight = jax.random.normal(kw, (D, C, P, P), dtype=jnp.float32) * 0.02
    bias = jax.random.normal(kb, (D,), dtype=jnp.float32) * 0.02

    # Plain-JAX reference of the PyTorch forward (f32).
    gh = IMG // P
    ref_patches = x.reshape(B, C, gh, P, gh, P).transpose(0, 2, 4, 1, 3, 5)
    ref_patches = ref_patches.reshape(B, gh * gh, C * P * P)
    ref = jnp.einsum("bnk,dk->bnd", ref_patches, weight.reshape(D, C * P * P)) + bias

    # f32 MXU path: matches the module numerics tightly.
    out_f32 = jax.block_until_ready(
        patch_embed(x, weight, bias, patch_size=P, mxu_dtype=None))
    assert out_f32.shape == (B, gh * gh, D), out_f32.shape
    assert jnp.allclose(out_f32, ref, atol=1e-4, rtol=1e-4), "f32 mismatch vs reference"

    # Default bf16-fed MXU fast path (f32 accumulation, f32 output).
    out_bf16 = jax.block_until_ready(patch_embed(x, weight, bias, patch_size=P))
    assert out_bf16.shape == (B, gh * gh, D), out_bf16.shape
    assert jnp.allclose(out_bf16, ref, atol=2e-2, rtol=2e-2), "bf16 mismatch vs reference"

    # bf16-output path (halves writeback traffic for bf16 downstream models).
    out_bf16_out = jax.block_until_ready(
        patch_embed(x, weight, bias, patch_size=P, out_dtype=jnp.bfloat16))
    assert out_bf16_out.dtype == jnp.bfloat16
    assert out_bf16_out.shape == (B, gh * gh, D), out_bf16_out.shape
    assert jnp.allclose(out_bf16_out.astype(jnp.float32), ref, atol=3e-2, rtol=3e-2), \
        "bf16-out mismatch vs reference"

    print("KERNEL_OK")
</pallas_src>

<mosaic_0001>
module attributes {stable_mosaic.version = 11 : i64} {
  func.func @_patch_embed_kernel(%arg0: i32, %arg1: memref<8x64xf32, #tpu.memory_space<vmem>>, %arg2: memref<64x128xf32, #tpu.memory_space<vmem>>, %arg3: memref<1x128xf32, #tpu.memory_space<vmem>>, %arg4: memref<8x128xf32, #tpu.memory_space<vmem>>) attributes {dimension_semantics = [#tpu.dimension_semantics<parallel>], iteration_bounds = array<i64: 4>, scalar_prefetch = 0 : i64, scratch_operands = 0 : i64, tpu.core_type = #tpu.core_type<tc>, window_params = [{transform_indices = @transform_0, window_bounds = array<i64: 8, 64>}, {pipeline_mode = #tpu.pipeline_mode<synchronous>, transform_indices = @transform_1, window_bounds = array<i64: 64, 128>}, {pipeline_mode = #tpu.pipeline_mode<synchronous>, transform_indices = @transform_2, window_bounds = array<i64: 1, 128>}, {transform_indices = @transform_3, window_bounds = array<i64: 8, 128>}]} {
    %c0 = arith.constant 0 : index
    %c0_0 = arith.constant 0 : index
    %0 = vector.load %arg1[%c0, %c0_0] : memref<8x64xf32, #tpu.memory_space<vmem>>, vector<8x64xf32>
    %c0_1 = arith.constant 0 : index
    %c0_2 = arith.constant 0 : index
    %1 = vector.load %arg2[%c0_1, %c0_2] : memref<64x128xf32, #tpu.memory_space<vmem>>, vector<64x128xf32>
    %cst = arith.constant dense<0.000000e+00> : vector<8x128xf32>
    %2 = tpu.matmul %0, %1, %cst {dimension_numbers = #tpu.dot_dimension_numbers<[1], [0], [0], [1], [0, 0, 1, 1], [], []>} : vector<8x64xf32>, vector<64x128xf32>, vector<8x128xf32> -> vector<8x128xf32>
    %c0_3 = arith.constant 0 : index
    %c0_4 = arith.constant 0 : index
    %3 = vector.load %arg3[%c0_3, %c0_4] : memref<1x128xf32, #tpu.memory_space<vmem>>, vector<1x128xf32>
    %4 = vector.broadcast %3 : vector<1x128xf32> to vector<8x128xf32>
    %5 = arith.addf %2, %4 : vector<8x128xf32>
    %c0_5 = arith.constant 0 : index
    %c0_6 = arith.constant 0 : index
    %6 = vector.load %arg4[%c0_5, %c0_6] : memref<8x128xf32, #tpu.memory_space<vmem>>, vector<8x128xf32>
    tpu.vector_store %arg4[%c0_5, %c0_6], %5 {strides = array<i32>} : memref<8x128xf32, #tpu.memory_space<vmem>>, vector<8x128xf32>,
    return
  }
  func.func @transform_0(%arg0: i32) -> (i32, i32) {
    %c0_i32 = arith.constant 0 : i32
    %c0_i32_0 = arith.constant 0 : i32
    return %arg0, %c0_i32 : i32, i32
  }
  func.func @transform_1(%arg0: i32) -> (i32, i32) {
    %c0_i32 = arith.constant 0 : i32
    %c0_i32_0 = arith.constant 0 : i32
    %c0_i32_1 = arith.constant 0 : i32
    return %c0_i32, %c0_i32_0 : i32, i32
  }
  func.func @transform_2(%arg0: i32) -> (i32, i32) {
    %c0_i32 = arith.constant 0 : i32
    %c0_i32_0 = arith.constant 0 : i32
    %c0_i32_1 = arith.constant 0 : i32
    return %c0_i32, %c0_i32_0 : i32, i32
  }
  func.func @transform_3(%arg0: i32) -> (i32, i32) {
    %c0_i32 = arith.constant 0 : i32
    %c0_i32_0 = arith.constant 0 : i32
    return %arg0, %c0_i32 : i32, i32
  }
}

</mosaic_0001>

<bundles_post_ra>
// kernel: patch_embed.1
= control target key start
LH: loop header
LB: loop body
LE: loop exit
PB: predicated region body
PF: predicated region fallthrough
CT: control target
= control target key end

     0   :  { %8 = vsyncpa [#allocation3], 0  ;;  %s639_s0 = inlined_call_operand.vmem [shape: f32[32,64], index: 0, kind: input, shape index: {}]   ;;  %s640_s1 = inlined_call_operand.vmem [shape: f32[64,128], index: 1, kind: input, shape index: {}]   ;;  %s641_s2 = inlined_call_operand.vmem [shape: f32[1,128], index: 2, kind: input, shape index: {}]   ;;  %s642_s3 = inlined_call_operand.hbm [shape: f32[32,128], index: 3, kind: output, shape index: {}]  }
   0x1   :  { %10 = vsyncpa [#allocation3 + $0x1], 0  ;;  %s512_s12 = smov 0   ;;  %s514_s13 = smov 0  }
   0x2   :  { %s516_s14 = smov 0   ;;  %s518_s15 = smov 0  }
   0x3 LB: > { %s533_s16 = sadd.s32 4294967295, %s486_s15   ;;  %s330_s17 = sadd.s32 4294967294, %s486_s15   ;;  %s486_s15 = sphi %s518_s15, %s648_s15   ;;  %s482_s14 = sphi %s516_s14, %s647_s14   ;;  %s478_s13 = sphi %s514_s13, %s646_s13   ;;  %s474_s12 = sphi %s512_s12, %s645_s12  }
   0x4   : > { %s537_s18 = sadd.s32 1, %s486_s15   ;;  %s91_s19 = sadd.s32 1, %s482_s14 }
   0x5   : > { %s88_s20 = ssub.s32 %s486_s15, %s537_s18  ;;  %p101_p0 = scmp.ne.s32.totalorder %s482_s14, %s478_s13 }
   0x6   : > { %p89_p1 = scmp.eq.s32.totalorder %s88_s20, 0  ;;  %p102_p2 = scmp.eq.s32.totalorder %s533_s16, 3 }
   0x7   : > { %p107_p3 = scmp.ne.s32.totalorder %s478_s13, %s474_s12  ;;  %p108_p4 = scmp.eq.s32.totalorder %s330_s17, 3 }
   0x8   : > { %s548_s21 = scalar_select %p89_p1, %s482_s14, %s91_s19  }
   0x9   : > { %p550_p5 = por %p102_p2, %p101_p0  ;;  %p554_p6 = por %p108_p4, %p107_p3 }
   0xa   : > { %p333_p7 = scmp.ge.s32.totalorder %s486_s15, 1  ;;  %p139_p8 = scmp.lt.s32.totalorder %s486_s15, 5 }
   0xc   : > { %p140_p9 = pnand %p333_p7, %p139_p8 }
   0xd   : > { %v167_v0 = vld [vmem:[%s640_s1] sm:$0xff] (!%p140_p9)  ;;  %v168_v1 = vld [vmem:[%s640_s1 + $0x8] sm:$0xff] (!%p140_p9)  ;;  %v169_v2 = vld [vmem:[%s640_s1 + $0x10] sm:$0xff] (!%p140_p9)  ;;  %v488_v3 = vmov (!%p140_p9), 0.0|0.0   ;;  %vm489_vm0 = vmmov (!%p140_p9), 0   ;;  %v490_v6 = vmov (!%p140_p9), 0.0  }
   0xe   : > { %143 = sbr.rel (%p140_p9) target bundleno = 259 (0x103), region = 32  ;;  %370 = vmatprep.subr.bf16.mxu0 (!%p140_p9), %v488_v3  ;;  %v371_v4 = vpack.c.bf16 (!%p140_p9), %v168_v1, %v167_v0  ;;  %v170_v5 = vld [vmem:[%s640_s1 + $0x18] sm:$0xff] (!%p140_p9)  ;;  %367 = vmatprep.mubr.msk.f32.mxu0 (!%p140_p9), %vm489_vm0, %v490_v6  ;;  %p162_p10 = scmp.lt.s32.totalorder (!%p140_p9), %s533_s16, 3  ;;  %v171_v8 = vld [vmem:[%s640_s1 + $0x20] sm:$0xff] (!%p140_p9)  ;;  %v172_v9 = vld [vmem:[%s640_s1 + $0x28] sm:$0xff] (!%p140_p9)  ;;  %vm182_vm1 = vcmask (!%p140_p9), 523264  }
   0xf   : > { %v374_v7 = vpack.c.bf16 (!%p140_p9), %v170_v5, %v169_v2  ;;  %v377_v10 = vpack.c.bf16 (!%p140_p9), %v172_v9, %v171_v8  ;;  %v173_v11 = vld [vmem:[%s640_s1 + $0x30] sm:$0xff] (!%p140_p9)  ;;  %v174_v12 = vld [vmem:[%s640_s1 + $0x38] sm:$0xff] (!%p140_p9)  ;;  %s159_s27 = sand.u32 (!%p140_p9), 1, %s478_s13   ;;  %v336_v15 = vld [vmem:[%s641_s2] ss:$0 sm:$0xff] (!%p140_p9)  ;;  %s339_s4 = sshll.u32 (!%p140_p9), %s533_s16, 7 }
  0x10   : > { %372 = vmatpush3.bf16.msra.mxu0 (!%p140_p9), %v371_v4  ;;  %v380_v13 = vpack.c.bf16 (!%p140_p9), %v174_v12, %v173_v11  ;;  %s334_s28 = sshll.u32 (!%p140_p9), %s159_s27, 3  ;;  %s258_s10 = scalar_lea.sflag (!%p140_p9), [#allocation3], %s159_s27 }
  0x11   : > { %373 = vmatprep.subr.bf16.mxu0 (!%p140_p9), %v488_v3  ;;  %s161_s5 = scalar_lea.vmem (!%p140_p9), [#allocation2], %s334_s28 }
  0x12   : > { %s271_s6 = sshll.u32 (!%p140_p9), %s161_s5, 4  ;;  %s599_s6 = int_to_ptr.vmem [resolvable:$true] %s271_s6 }
  0x13   : > { %s424_s11 = scalar_lea.vmem (!%p140_p9), %s599_s6, 128 }
  0x14   : > { %375 = vmatpush3.bf16.msra.mxu0 (!%p140_p9), %v374_v7  ;;  %p425_p11 = scmp.ne.s32.totalorder (!%p140_p9), %s599_s6, %s424_s11 }
  0x15   : > { %s163_s9 = scalar_select %p162_p10, %s533_s16, 3  ;;  %376 = vmatprep.subr.bf16.mxu0 %v488_v3 }
  0x16   : > { %p426_p12 = pnand %p425_p11, %p550_p5  ;;  %s491_s16 = smov [#allocation2]  }
  0x17   : > { %s335_s20 = sshll.u32 %s163_s9, 3  ;;  %s597_s9 = scalar_lea.hbm %s642_s3, %s339_s4 }
  0x18   : > { %378 = vmatpush3.bf16.msra.mxu0 %v377_v10  ;;  %s165_s26 = scalar_lea.vmem %s639_s0, %s335_s20  ;;  %p427_p13 = pneg %p426_p12 }
  0x19   : > { %379 = vmatprep.subr.bf16.mxu0 %v488_v3  ;;  %v166_v14 = vld [vmem:[%s165_s26] sm:$0xff]  ;;  %s428_s17 = sshll.u32 %s491_s16, 4  ;;  %s429_s17 = int_to_ptr.vmem [resolvable:$false] %s428_s17 }
  0x1a   : > { %s430_s19 = scalar_lea.vmem %s429_s17, 256  ;;  %p431_p0 = scmp.lt.s32.totalorder %s599_s6, %s429_s17 }
  0x1b   : > { %p432_p1 = scmp.lt.s32.totalorder %s430_s19, %s424_s11 }
  0x1c   : > { %381 = vmatpush3.bf16.msra.mxu0 %v380_v13 }
  0x1d   : > { %p433_p2 = por %p432_p1, %p431_p0 }
  0x1f   : > { %368 = vmatmul.mubr.msk.f32.vlgmr.msra.gmra.mrb[0].mxu0 %vm182_vm1, %v166_v14  ;;  %p434_p3 = pnand %p433_p2, %p427_p13 }
  0xf2   : > { %v252_v16 = vpop.f32.mrb[0].mxu0 }
  0xf3   : > { %v253_v17 = vadd.f32 %v336_v15, %v252_v16  ;;  %v369_v18 = vpop.f32.mrb[1].mxu0 }
  0xf5   : > { %256 = vst [vmem:[%s161_s5] sm:$0xff] %v253_v17 }
  0xf6   : > { %437 = shalt.err (!%p434_p3)
}
  0xf7   : > { %s438_s20 = scalar_lea.hbm %s597_s9, 128  ;;  %s442_s26 = scalar_lea.hbm %s642_s3, 512 }
  0xf8   : > { %p439_p4 = scmp.ne.s32.totalorder %s597_s9, %s438_s20  ;;  %p443_p9 = scmp.lt.u32.totalorder %s597_s9, %s642_s3 }
  0xf9   : > { %p444_p10 = scmp.lt.u32.totalorder %s442_s26, %s438_s20  ;;  %p446_p12 = scmp.lt.u32.totalorder %s438_s20, %s597_s9 }
  0xfa   : > { %p440_p7 = pnand %p439_p4, %p550_p5 }
  0xfb   : > { %p445_p11 = por %p444_p10, %p443_p9 }
  0xfc   : > { %p441_p8 = pneg %p440_p7 }
  0xfd   : > { %p447_p13 = por %p446_p12, %p445_p11 }
  0xff   : > { %p448_p0 = pnand %p447_p13, %p441_p8 }
 0x101   : > { %451 = shalt.err (!%p448_p0)
}
 0x102   : > { %382 = dma.vmem_to_hbm [thread:$0]  (%p550_p5), %s599_s6, 128, %s597_s9, %s258_s10  }
 0x103 PF: > { %p388_p1 = scmp.ge.s32.totalorder %s486_s15, 2  ;;  %s283_s29 = sand.u32 1, %s474_s12  }
 0x104   : > { %s284_s30 = scalar_lea.sflag [#allocation3], %s283_s29 }
 0x105   : > { %p385_p2 = pnand %p388_p1, %p554_p6 }
 0x107   : > { %469 = dma.done.wait (!%p385_p2), %s284_s30, 128  }
 0x108   : > { %471 = vsyncadd (!%p385_p2), %s284_s30, 4294967168  ;;  %p13_p3 = scmp.ge.s32.totalorder %s537_s18, 6   ;;  %s645_s12 = smov %s478_s13 }
 0x109   : > { %s646_s13 = smov %s482_s14  ;;  %s647_s14 = smov %s548_s21 }
 0x10a   : > { %s648_s15 = smov %s537_s18  ;;  %15 = sbr.rel (!%p13_p3) target bundleno = 3 (0x3), region = 67 }
 0x111   :  { %289 = vsyncpa [#allocation3], 1 }
 0x112   :  { %291 = vsyncpa [#allocation3 + $0x1], 1 }

</bundles_post_ra>
